<compile_context>
chip_gen: v7x
topology: tpu7x:2x2x1
jax: 0.10.0
libtpu: 0.0.40
codegen_flags: <defaults>
</compile_context>

<pallas_src>
import numpy as np
import jax
import jax.numpy as jnp
from jax import lax
from jax.experimental import pallas as pl
from jax.experimental.pallas import tpu as pltpu

# Small shapes consistent with the module's forward pass.
N, C_IN, H, W = 2, 4, 16, 16          # batch, in-channels, spatial
C_OUT = 32                            # conv feature channels (encoder_dim stand-in)
N_ATTRS = 64                          # stands in for the 600-way attribute head
ENC = 14                              # encoded_image_size (module default)
K = 3
HW = H * W
KKC = K * K * C_IN
ENC2 = ENC * ENC
BN_EPS = 1e-5


# --------------------------- precomputed constants ---------------------------

def _adaptive_pool_matrix(in_size, out_size):
    """1-D PyTorch AdaptiveAvgPool matrix: (in_size, out_size); column i averages
    the window [floor(i*in/out), ceil((i+1)*in/out))."""
    m = np.zeros((in_size, out_size), dtype=np.float32)
    for i in range(out_size):
        s = (i * in_size) // out_size
        e = -((-(i + 1) * in_size) // out_size)   # ceil
        m[s:e, i] = 1.0 / (e - s)
    return m


_PH = _adaptive_pool_matrix(H, ENC)
_PW = _adaptive_pool_matrix(W, ENC)
# POOL[h*W+w, i*ENC+j] = 1/(nh*nw) over the (i,j) adaptive window -> pooling == matmul.
_POOL_MAT_NP = np.einsum("hi,wj->hwij", _PH, _PW).reshape(HW, ENC2).astype(np.float32)

# Block-diagonal per-image averaging matrix: (N*HW, N), entries 1/HW.
_GROUP_MAT_NP = np.zeros((N * HW, N), dtype=np.float32)
for _n in range(N):
    _GROUP_MAT_NP[_n * HW:(_n + 1) * HW, _n] = 1.0 / HW


# ------------------------------ Pallas kernel --------------------------------

def fused_encoder_kernel(xcol_ref, w_ref, shift_ref, wcls_ref, bcls_ref,
                         pool_ref, group_ref, feat_ref, attrs_ref):
    """Fused Conv3x3(+folded BN)+ReLU -> {classifier attrs, adaptive avg-pool}.

    xcol_ref : (KKC, N*HW)      lane-dense im2col patches (spatial on lanes)
    w_ref    : (C_OUT, KKC)     conv weight * bn_scale (folded)
    shift_ref: (C_OUT, 1)       (conv_b - bn_mean)*scale + beta
    wcls_ref : (N_ATTRS, C_OUT) classifier weight (PyTorch layout, untransposed)
    bcls_ref : (N_ATTRS, 1)     classifier bias
    pool_ref : (HW, ENC2)       adaptive avg-pool matrix
    group_ref: (N*HW, N)        per-image global-average matrix
    feat_ref : (N, C_OUT, ENC2) pooled features, channels-first
    attrs_ref: (N_ATTRS, N)     attrs, transposed (wrapper transposes back)
    """
    # Conv as a single transposed GEMM: output lanes = N*HW = 512 (lane-dense).
    y = jnp.dot(w_ref[...], xcol_ref[...], preferred_element_type=jnp.float32)
    y = jnp.maximum(y + shift_ref[...], 0.0)                    # folded BN + ReLU

    # Attrs head: per-image global average pool + Linear, both on the MXU.
    pooled_t = jnp.dot(y, group_ref[...], preferred_element_type=jnp.float32)   # (C_OUT, N)
    attrs_ref[...] = (jnp.dot(wcls_ref[...], pooled_t,
                              preferred_element_type=jnp.float32)
                      + bcls_ref[...])                                           # (N_ATTRS, N)

    # Encoder head: AdaptiveAvgPool2d((ENC,ENC)) as one matmul per image.
    for n in range(N):                       # N is tiny & static -> fully unrolled
        yn = y[:, n * HW:(n + 1) * HW]       # (C_OUT, HW); 256-lane-aligned slice
        feat_ref[n] = jnp.dot(yn, pool_ref[...], preferred_element_type=jnp.float32)


# -------------------------------- Wrapper ------------------------------------

@jax.jit
def future_and_attr_encoder(x_nchw, params):
    """Forward pass of FutureAndAttrEncoder: returns (features NHWC pooled, attrs)."""
    # ---- XLA glue: NCHW -> NHWC, pad, im2col in the lane-dense (KKC, N*HW) layout ----
    # TODO(synk): im2col could be rebuilt in-kernel from one padded VMEM tile with 9
    # static slices, but that requires non-tile-aligned in-kernel reshapes; at ~72 KiB
    # the host-side construction is negligible, so it stays in the wrapper.
    x = jnp.transpose(x_nchw, (0, 2, 3, 1))                          # (N, H, W, C_IN)
    xp = jnp.pad(x, ((0, 0), (1, 1), (1, 1), (0, 0)))
    patches = [xp[:, dh:dh + H, dw:dw + W, :] for dh in range(K) for dw in range(K)]
    x_col = (jnp.stack(patches, axis=0)          # (K*K, N, H, W, C_IN)
             .transpose(0, 4, 1, 2, 3)           # (K*K, C_IN, N, H, W)
             .reshape(KKC, N * HW))

    # ---- fold conv bias + eval-mode BatchNorm into the GEMM weight / shift ----
    scale = params["bn_gamma"] * lax.rsqrt(params["bn_var"] + BN_EPS)          # (C_OUT,)
    w_gemm = params["conv_w"].transpose(0, 2, 3, 1).reshape(C_OUT, KKC)        # (C_OUT, KKC)
    w_scaled = w_gemm * scale[:, None]
    shift = ((params["conv_b"] - params["bn_mean"]) * scale
             + params["bn_beta"]).reshape(C_OUT, 1)

    w_cls = params["cls_w"]                       # (N_ATTRS, C_OUT), used as-is
    b_cls = params["cls_b"].reshape(N_ATTRS, 1)

    # Constant matrices (compile-time constants under jit; no per-call transfer).
    pool_mat = jnp.asarray(_POOL_MAT_NP)
    group_mat = jnp.asarray(_GROUP_MAT_NP)

    # ---- one fused, grid-less Pallas call over the whole (tiny) batch ----
    vmem = pl.BlockSpec(memory_space=pltpu.MemorySpace.VMEM)   # whole array in VMEM
    feat_chw, attrs_t = pl.pallas_call(
        fused_encoder_kernel,
        out_shape=(jax.ShapeDtypeStruct((N, C_OUT, ENC2), jnp.float32),
                   jax.ShapeDtypeStruct((N_ATTRS, N), jnp.float32)),
        in_specs=[vmem] * 7,
        out_specs=(vmem, vmem),
    )(x_col, w_scaled, shift, w_cls, b_cls, pool_mat, group_mat)

    # Module's final `.permute(0, 2, 3, 1)` on the tiny pooled map (~50 KiB) + attrs layout.
    features = jnp.transpose(feat_chw.reshape(N, C_OUT, ENC, ENC), (0, 2, 3, 1))
    attrs = attrs_t.T
    return features, attrs


# ------------------------------ Reference (JAX) -------------------------------

def reference(x_nchw, params):
    x = jnp.transpose(x_nchw, (0, 2, 3, 1))
    w_hwio = jnp.transpose(params["conv_w"], (2, 3, 1, 0))
    conv = lax.conv_general_dilated(
        x, w_hwio, window_strides=(1, 1), padding="SAME",
        dimension_numbers=("NHWC", "HWIO", "NHWC")) + params["conv_b"]
    scale = params["bn_gamma"] / jnp.sqrt(params["bn_var"] + BN_EPS)
    feat = jnp.maximum((conv - params["bn_mean"]) * scale + params["bn_beta"], 0.0)

    # attrs = classifier(flatten(adaptive_avg_pool2d(relu(feat), (1,1))))
    pooled = jnp.mean(feat, axis=(1, 2))
    attrs = pooled @ params["cls_w"].T + params["cls_b"]

    # encoder: AdaptiveAvgPool2d((ENC, ENC)) with PyTorch window formula, then NHWC
    rows = []
    for i in range(ENC):
        s, e = (i * H) // ENC, -((-(i + 1) * H) // ENC)
        rows.append(jnp.mean(feat[:, s:e, :, :], axis=1, keepdims=True))
    tmp = jnp.concatenate(rows, axis=1)                 # (N, ENC, W, C_OUT)
    cols = []
    for j in range(ENC):
        s, e = (j * W) // ENC, -((-(j + 1) * W) // ENC)
        cols.append(jnp.mean(tmp[:, :, s:e, :], axis=2, keepdims=True))
    enc_feat = jnp.concatenate(cols, axis=2)            # (N, ENC, ENC, C_OUT)
    return enc_feat, attrs


# ---------------------------------- Main --------------------------------------

if __name__ == "__main__":
    key = jax.random.PRNGKey(0)
    ks = jax.random.split(key, 9)
    params = {
        "conv_w": 0.1 * jax.random.normal(ks[0], (C_OUT, C_IN, K, K), jnp.float32),
        "conv_b": 0.1 * jax.random.normal(ks[1], (C_OUT,), jnp.float32),
        "bn_gamma": 1.0 + 0.1 * jax.random.normal(ks[2], (C_OUT,), jnp.float32),
        "bn_beta": 0.1 * jax.random.normal(ks[3], (C_OUT,), jnp.float32),
        "bn_mean": 0.1 * jax.random.normal(ks[4], (C_OUT,), jnp.float32),
        "bn_var": jax.random.uniform(ks[5], (C_OUT,), jnp.float32, 0.5, 1.5),
        "cls_w": 0.1 * jax.random.normal(ks[6], (N_ATTRS, C_OUT), jnp.float32),
        "cls_b": 0.1 * jax.random.normal(ks[7], (N_ATTRS,), jnp.float32),
    }
    x = jax.random.normal(ks[8], (N, C_IN, H, W), jnp.float32)

    features, attrs = future_and_attr_encoder(x, params)
    jax.block_until_ready((features, attrs))

    ref_features, ref_attrs = reference(x, params)
    assert features.shape == (N, ENC, ENC, C_OUT), features.shape
    assert attrs.shape == (N, N_ATTRS), attrs.shape
    assert jnp.allclose(features, ref_features, rtol=1e-4, atol=1e-4)
    assert jnp.allclose(attrs, ref_attrs, rtol=1e-4, atol=1e-4)

    print("KERNEL_OK")
</pallas_src>

<mosaic_0001>
module attributes {stable_mosaic.version = 11 : i64} {
  func.func @fused_encoder_kernel(%arg0: memref<36x512xf32, #tpu.memory_space<vmem>>, %arg1: memref<32x36xf32, #tpu.memory_space<vmem>>, %arg2: memref<32x1xf32, #tpu.memory_space<vmem>>, %arg3: memref<64x32xf32, #tpu.memory_space<vmem>>, %arg4: memref<64x1xf32, #tpu.memory_space<vmem>>, %arg5: memref<256x196xf32, #tpu.memory_space<vmem>>, %arg6: memref<512x2xf32, #tpu.memory_space<vmem>>, %arg7: memref<2x32x196xf32, #tpu.memory_space<vmem>>, %arg8: memref<64x2xf32, #tpu.memory_space<vmem>>) attributes {dimension_semantics = [], scalar_prefetch = 0 : i64, scratch_operands = 0 : i64, tpu.core_type = #tpu.core_type<tc>} {
    %c0 = arith.constant 0 : index
    %c0_0 = arith.constant 0 : index
    %0 = vector.load %arg1[%c0, %c0_0] : memref<32x36xf32, #tpu.memory_space<vmem>>, vector<32x36xf32>
    %c0_1 = arith.constant 0 : index
    %c0_2 = arith.constant 0 : index
    %1 = vector.load %arg0[%c0_1, %c0_2] : memref<36x512xf32, #tpu.memory_space<vmem>>, vector<36x512xf32>
    %cst = arith.constant dense<0.000000e+00> : vector<32x512xf32>
    %2 = tpu.matmul %0, %1, %cst {dimension_numbers = #tpu.dot_dimension_numbers<[1], [0], [0], [1], [0, 0, 1, 1], [], []>} : vector<32x36xf32>, vector<36x512xf32>, vector<32x512xf32> -> vector<32x512xf32>
    %c0_3 = arith.constant 0 : index
    %c0_4 = arith.constant 0 : index
    %3 = vector.load %arg2[%c0_3, %c0_4] : memref<32x1xf32, #tpu.memory_space<vmem>>, vector<32x1xf32>
    %4 = vector.broadcast %3 : vector<32x1xf32> to vector<32x512xf32>
    %5 = arith.addf %2, %4 : vector<32x512xf32>
    %cst_5 = arith.constant 0.000000e+00 : f32
    %6 = vector.broadcast %cst_5 : f32 to vector<32x512xf32>
    %7 = arith.maximumf %5, %6 : vector<32x512xf32>
    %c0_6 = arith.constant 0 : index
    %c0_7 = arith.constant 0 : index
    %8 = vector.load %arg6[%c0_6, %c0_7] : memref<512x2xf32, #tpu.memory_space<vmem>>, vector<512x2xf32>
    %cst_8 = arith.constant dense<0.000000e+00> : vector<32x2xf32>
    %9 = tpu.matmul %7, %8, %cst_8 {dimension_numbers = #tpu.dot_dimension_numbers<[1], [0], [0], [1], [0, 0, 1, 1], [], []>} : vector<32x512xf32>, vector<512x2xf32>, vector<32x2xf32> -> vector<32x2xf32>
    %c0_9 = arith.constant 0 : index
    %c0_10 = arith.constant 0 : index
    %10 = vector.load %arg3[%c0_9, %c0_10] : memref<64x32xf32, #tpu.memory_space<vmem>>, vector<64x32xf32>
    %cst_11 = arith.constant dense<0.000000e+00> : vector<64x2xf32>
    %11 = tpu.matmul %10, %9, %cst_11 {dimension_numbers = #tpu.dot_dimension_numbers<[1], [0], [0], [1], [0, 0, 1, 1], [], []>} : vector<64x32xf32>, vector<32x2xf32>, vector<64x2xf32> -> vector<64x2xf32>
    %c0_12 = arith.constant 0 : index
    %c0_13 = arith.constant 0 : index
    %12 = vector.load %arg4[%c0_12, %c0_13] : memref<64x1xf32, #tpu.memory_space<vmem>>, vector<64x1xf32>
    %13 = vector.broadcast %12 : vector<64x1xf32> to vector<64x2xf32>
    %14 = arith.addf %11, %13 : vector<64x2xf32>
    %c0_14 = arith.constant 0 : index
    %c0_15 = arith.constant 0 : index
    %15 = vector.load %arg8[%c0_14, %c0_15] : memref<64x2xf32, #tpu.memory_space<vmem>>, vector<64x2xf32>
    tpu.vector_store %arg8[%c0_14, %c0_15], %14 {strides = array<i32>} : memref<64x2xf32, #tpu.memory_space<vmem>>, vector<64x2xf32>,
    %16 = vector.extract_strided_slice %7 {offsets = [0, 0], sizes = [32, 256], strides = [1, 1]} : vector<32x512xf32> to vector<32x256xf32>
    %c0_16 = arith.constant 0 : index
    %c0_17 = arith.constant 0 : index
    %17 = vector.load %arg5[%c0_16, %c0_17] : memref<256x196xf32, #tpu.memory_space<vmem>>, vector<256x196xf32>
    %cst_18 = arith.constant dense<0.000000e+00> : vector<32x196xf32>
    %18 = tpu.matmul %16, %17, %cst_18 {dimension_numbers = #tpu.dot_dimension_numbers<[1], [0], [0], [1], [0, 0, 1, 1], [], []>} : vector<32x256xf32>, vector<256x196xf32>, vector<32x196xf32> -> vector<32x196xf32>
    %c0_19 = arith.constant 0 : index
    %c0_20 = arith.constant 0 : index
    %c0_21 = arith.constant 0 : index
    %19 = vector.load %arg7[%c0_19, %c0_20, %c0_21] : memref<2x32x196xf32, #tpu.memory_space<vmem>>, vector<1x32x196xf32>
    %20 = vector.shape_cast %19 : vector<1x32x196xf32> to vector<32x196xf32>
    %21 = vector.shape_cast %18 : vector<32x196xf32> to vector<1x32x196xf32>
    tpu.vector_store %arg7[%c0_19, %c0_20, %c0_21], %21 {strides = array<i32>} : memref<2x32x196xf32, #tpu.memory_space<vmem>>, vector<1x32x196xf32>,
    %22 = vector.extract_strided_slice %7 {offsets = [0, 256], sizes = [32, 256], strides = [1, 1]} : vector<32x512xf32> to vector<32x256xf32>
    %c0_22 = arith.constant 0 : index
    %c0_23 = arith.constant 0 : index
    %23 = vector.load %arg5[%c0_22, %c0_23] : memref<256x196xf32, #tpu.memory_space<vmem>>, vector<256x196xf32>
    %cst_24 = arith.constant dense<0.000000e+00> : vector<32x196xf32>
    %24 = tpu.matmul %22, %23, %cst_24 {dimension_numbers = #tpu.dot_dimension_numbers<[1], [0], [0], [1], [0, 0, 1, 1], [], []>} : vector<32x256xf32>, vector<256x196xf32>, vector<32x196xf32> -> vector<32x196xf32>
    %c1 = arith.constant 1 : index
    %c0_25 = arith.constant 0 : index
    %c0_26 = arith.constant 0 : index
    %25 = vector.load %arg7[%c1, %c0_25, %c0_26] : memref<2x32x196xf32, #tpu.memory_space<vmem>>, vector<1x32x196xf32>
    %26 = vector.shape_cast %25 : vector<1x32x196xf32> to vector<32x196xf32>
    %27 = vector.shape_cast %24 : vector<32x196xf32> to vector<1x32x196xf32>
    tpu.vector_store %arg7[%c1, %c0_25, %c0_26], %27 {strides = array<i32>} : memref<2x32x196xf32, #tpu.memory_space<vmem>>, vector<1x32x196xf32>,
    return
  }
}

</mosaic_0001>

<bundles_post_ra>
// kernel: future_and_attr_encoder.1
= control target key start
LH: loop header
LB: loop body
LE: loop exit
PB: predicated region body
PF: predicated region fallthrough
CT: control target
= control target key end

     0   :  { %v1425_v3 = vmov 0.0   ;;  %v1426_v8 = vmov 0   ;;  %vm89_vm0 = vcmask 1043456   ;;  %vm76_vm1 = vcmask 293888   ;;  %s2344_s0 = inlined_call_operand.vmem [shape: f32[36,512], index: 0, kind: input, shape index: {}]   ;;  %s2345_s2 = inlined_call_operand.vmem [shape: f32[32,1], index: 2, kind: input, shape index: {}]   ;;  %s2346_s1 = inlined_call_operand.vmem [shape: f32[32,36], index: 1, kind: input, shape index: {}]   ;;  %s2347_s6 = inlined_call_operand.vmem [shape: f32[512,2], index: 6, kind: input, shape index: {}]   ;;  %s2348_s4 = inlined_call_operand.vmem [shape: f32[64,1], index: 4, kind: input, shape index: {}]   ;;  %s2349_s5 = inlined_call_operand.vmem [shape: f32[256,196], index: 5, kind: input, shape index: {}]   ;;  %s2350_s3 = inlined_call_operand.vmem [shape: f32[64,32], index: 3, kind: input, shape index: {}]   ;;  %s2351_s7 = inlined_call_operand.vmem [shape: f32[2,32,196], index: 7, kind: output, shape index: {0}]   ;;  %s2352_s8 = inlined_call_operand.vmem [shape: f32[64,2], index: 8, kind: output, shape index: {1}]  }
   0x1   :  { %v33_v0 = vld [vmem:[%s2344_s0 + $0x8] sm:$0xff]  ;;  %v35_v2 = vld [vmem:[%s2344_s0 + $0x18] sm:$0xff]  ;;  %166 = vmatprep.mubr.f32.mxu0 %v1425_v3  ;;  %255 = vmatprep.mubr.f32.mxu1 %v1425_v3  ;;  %v32_v6 = vld [vmem:[%s2344_s0] sm:$0xff]  ;;  %vm586_vm2 = vcmask 261120   ;;  %vm879_vm3 = vcmask 556032   ;;  %vm716_vm4 = vcmask 15360  }
   0x2   :  { %v37_v1 = vld [vmem:[%s2344_s0 + $0x28] sm:$0xff]  ;;  %v39_v5 = vld [vmem:[%s2344_s0 + $0x38] sm:$0xff]  ;;  %v36_v7 = vld [vmem:[%s2344_s0 + $0x20] sm:$0xff]  ;;  %1423 = vset.pattern.permute.xlu0 %v1426_v8  ;;  %1424 = vset.pattern.permute.xlu1 %v1426_v8 }
   0x3   :  { %v1205_v4 = vpack.c.bf16 %v37_v1, %v33_v0  ;;  %v1213_v9 = vpack.c.bf16 %v39_v5, %v35_v2  ;;  %v1207_v10 = vpack.c.bf16 %v36_v7, %v32_v6  ;;  %v34_v11 = vld [vmem:[%s2344_s0 + $0x10] sm:$0xff]  ;;  %v41_v13 = vld [vmem:[%s2344_s0 + $0x48] sm:$0xff]  ;;  %v43_v16 = vld [vmem:[%s2344_s0 + $0x58] sm:$0xff] }
   0x4   :  { %v38_v12 = vld [vmem:[%s2344_s0 + $0x30] sm:$0xff]  ;;  %v45_v15 = vld [vmem:[%s2344_s0 + $0x68] sm:$0xff]  ;;  %v47_v17 = vld [vmem:[%s2344_s0 + $0x78] sm:$0xff] }
   0x5   :  { %1206 = vmatprep.subr.bf16.mxu0 %v1205_v4  ;;  %v1215_v14 = vpack.c.bf16 %v38_v12, %v34_v11  ;;  %1214 = vmatprep.subr.bf16.mxu1 %v1213_v9  ;;  %v1209_v18 = vpack.c.bf16 %v45_v15, %v41_v13  ;;  %v1217_v19 = vpack.c.bf16 %v47_v17, %v43_v16  ;;  %v40_v20 = vld [vmem:[%s2344_s0 + $0x40] sm:$0xff]  ;;  %v42_v22 = vld [vmem:[%s2344_s0 + $0x50] sm:$0xff]  ;;  %v49_v26 = vld [vmem:[%s2344_s0 + $0x88] sm:$0xf] }
   0x6   :  { %1208 = vmatpush1.bf16.msra.mxu0 %v1207_v10  ;;  %v44_v21 = vld [vmem:[%s2344_s0 + $0x60] sm:$0xff]  ;;  %v46_v24 = vld [vmem:[%s2344_s0 + $0x70] sm:$0xff]  ;;  %v51_v27 = vld [vmem:[%s2344_s0 + $0x98] sm:$0xf] }
   0x7   :  { %1216 = vmatpush1.bf16.msra.mxu1 %v1215_v14  ;;  %v1211_v23 = vpack.c.bf16 %v44_v21, %v40_v20  ;;  %1210 = vmatprep.subr.bf16.mxu0 %v1209_v18  ;;  %v1219_v25 = vpack.c.bf16 %v46_v24, %v42_v22  ;;  %v52_v28 = vld [vmem:[%s2345_s2] sm:$0xff]  ;;  %v54_v29 = vld [vmem:[%s2345_s2 + $0x10] sm:$0xff]  ;;  %v53_v33 = vld [vmem:[%s2345_s2 + $0x8] sm:$0xff] }
   0x8   :  { %1218 = vmatprep.subr.bf16.mxu1 %v1217_v19  ;;  %v48_v30 = vld [vmem:[%s2344_s0 + $0x80] sm:$0xf]  ;;  %v50_v31 = vld [vmem:[%s2344_s0 + $0x90] sm:$0xf]  ;;  %58 = vperm.xlu0 %1423, %v52_v28   ;;  %v55_v34 = vld [vmem:[%s2345_s2 + $0x18] sm:$0xff] }
   0x9   :  { %v28_v32 = vld [vmem:[%s2346_s1] sm:$0xff]  ;;  %68 = vperm.xlu1 %1424, %v54_v29   ;;  %v345_v36 = vld [vmem:[%s2347_s6 + $0x188] sm:$0xff]  ;;  %v346_v44 = vld [vmem:[%s2347_s6 + $0x190] sm:$0xff] }
   0xa   :  { %1212 = vmatpush1.bf16.msra.mxu0 %v1211_v23  ;;  %v344_v35 = vld [vmem:[%s2347_s6 + $0x180] sm:$0xff]  ;;  %v313_v39 = vld [vmem:[%s2347_s6 + $0x88] sm:$0xff]  ;;  %v347_v45 = vld [vmem:[%s2347_s6 + $0x198] sm:$0xff] }
   0xb   :  { %1220 = vmatpush1.bf16.msra.mxu1 %v1219_v25  ;;  %1057 = vmatprep.subr.msk.mxu0 %vm89_vm0, %v49_v26  ;;  %v312_v37 = vld [vmem:[%s2347_s6 + $0x80] sm:$0xff]  ;;  %v1253_v38 = vpack.c.bf16 %v345_v36, %v344_v35  ;;  %v329_v41 = vld [vmem:[%s2347_s6 + $0x108] sm:$0xff]  ;;  %v1257_v51 = vpack.c.bf16 %v347_v45, %v346_v44  ;;  %v30_v52 = vld [vmem:[%s2346_s1 + $0x10] sm:$0xff] }
   0xc   :  { %1063 = vmatprep.subr.msk.mxu1 %vm89_vm0, %v51_v27  ;;  %v328_v40 = vld [vmem:[%s2347_s6 + $0x100] sm:$0xff]  ;;  %v29_v42 = vld [vmem:[%s2346_s1 + $0x8] sm:$0xff]  ;;  %v1221_v43 = vpack.c.bf16 %v313_v39, %v312_v37  ;;  %63 = vperm.xlu0 %1423, %v53_v33   ;;  %v314_v53 = vld [vmem:[%s2347_s6 + $0x90] sm:$0xff] }
   0xd   :  { %v538_v46 = vld [vmem:[%s2348_s4] sm:$0xff]  ;;  %73 = vperm.xlu1 %1424, %v55_v34   ;;  %v1255_v47 = vpack.c.bf16 %v329_v41, %v328_v40  ;;  %v539_v48 = vld [vmem:[%s2348_s4 + $0x8] sm:$0xff]  ;;  %v315_v54 = vld [vmem:[%s2347_s6 + $0x98] sm:$0xff] }
   0xe   :  { %1058 = vmatpush1.msk.msra.mxu0 %vm89_vm0, %v48_v30  ;;  %v296_v49 = vld [vmem:[%s2347_s6] sm:$0xff]  ;;  %v297_v50 = vld [vmem:[%s2347_s6 + $0x8] sm:$0xff]  ;;  %v540_v55 = vld [vmem:[%s2348_s4 + $0x10] sm:$0xff]  ;;  %v1225_v61 = vpack.c.bf16 %v315_v54, %v314_v53 }
   0xf   :  { %1064 = vmatpush1.msk.msra.mxu1 %vm89_vm0, %v50_v31  ;;  %1059 = vmatmul.mubr.msk.f32.vlgmr.msra.gmra.mrb[0].mxu0 %vm76_vm1, %v28_v32  ;;  %v31_v56 = vld [vmem:[%s2346_s1 + $0x18] sm:$0xff]  ;;  %v1223_v58 = vpack.c.bf16 %v297_v50, %v296_v49  ;;  %v330_v59 = vld [vmem:[%s2347_s6 + $0x110] sm:$0xff]  ;;  %v348_v0 = vld [vmem:[%s2347_s6 + $0x1a0] sm:$0xff] }
  0x10   :  { %1065 = vmatmul.mubr.msk.f32.vlgmr.msra.gmra.mrb[0].mxu1 %vm76_vm1, %v28_v32  ;;  %172 = vmatprep.mubr.f32.mxu0 %v1425_v3  ;;  %v541_v57 = vld [vmem:[%s2348_s4 + $0x18] sm:$0xff]  ;;  %v298_v62 = vld [vmem:[%s2347_s6 + $0x10] sm:$0xff]  ;;  %v349_v1 = vld [vmem:[%s2347_s6 + $0x1a8] sm:$0xff] }
  0x11   :  { %261 = vmatprep.mubr.f32.mxu1 %v1425_v3  ;;  %1254 = vmatprep.subr.bf16.mxu1 %v1253_v38  ;;  %v331_v60 = vld [vmem:[%s2347_s6 + $0x118] sm:$0xff]  ;;  %v316_v2 = vld [vmem:[%s2347_s6 + $0xa0] sm:$0xff]  ;;  %v317_v4 = vld [vmem:[%s2347_s6 + $0xa8] sm:$0xff]  ;;  %v1261_v10 = vpack.c.bf16 %v349_v1, %v348_v0 }
  0x12   :  { %1222 = vmatprep.subr.bf16.mxu0 %v1221_v43  ;;  %548 = vperm.xlu0 %1423, %v538_v46   ;;  %v299_v63 = vld [vmem:[%s2347_s6 + $0x18] sm:$0xff]  ;;  %v542_v5 = vld [vmem:[%s2348_s4 + $0x20] sm:$0xff]  ;;  %v1259_v6 = vpack.c.bf16 %v331_v60, %v330_v59  ;;  %v543_v7 = vld [vmem:[%s2348_s4 + $0x28] sm:$0xff]  ;;  %v1229_v11 = vpack.c.bf16 %v317_v4, %v316_v2 }
  0x13   :  { %1060 = vmatmul.mubr.msk.f32.gmra.mrb[2].mxu0 %vm76_vm1, %v29_v42  ;;  %553 = vperm.xlu1 %1424, %v539_v48   ;;  %v1227_v8 = vpack.c.bf16 %v299_v63, %v298_v62  ;;  %v332_v9 = vld [vmem:[%s2347_s6 + $0x120] sm:$0xff]  ;;  %v301_v13 = vld [vmem:[%s2347_s6 + $0x28] sm:$0xff]  ;;  %v350_v14 = vld [vmem:[%s2347_s6 + $0x1b0] sm:$0xff] }
  0x14   :  { %1066 = vmatmul.mubr.msk.f32.gmra.mrb[2].mxu1 %vm76_vm1, %v29_v42  ;;  %178 = vmatprep.mubr.f32.mxu0 %v1425_v3  ;;  %v300_v12 = vld [vmem:[%s2347_s6 + $0x20] sm:$0xff]  ;;  %v351_v15 = vld [vmem:[%s2347_s6 + $0x1b8] sm:$0xff]  ;;  %v318_v16 = vld [vmem:[%s2347_s6 + $0xb0] sm:$0xff] }
  0x15   :  { %267 = vmatprep.mubr.f32.mxu1 %v1425_v3  ;;  %1256 = vmatpush3.bf16.msra.mxu1 %v1255_v47  ;;  %v319_v17 = vld [vmem:[%s2347_s6 + $0xb8] sm:$0xff]  ;;  %v544_v18 = vld [vmem:[%s2348_s4 + $0x30] sm:$0xff]  ;;  %v1231_v21 = vpack.c.bf16 %v301_v13, %v300_v12  ;;  %v1265_v25 = vpack.c.bf16 %v351_v15, %v350_v14  ;;  %v352_v28 = vld [vmem:[%s2347_s6 + $0x1c0] sm:$0xff] }
  0x16   :  { %1258 = vmatprep.subr.bf16.mxu1 %v1257_v51  ;;  %558 = vperm.xlu0 %1423, %v540_v55   ;;  %v545_v19 = vld [vmem:[%s2348_s4 + $0x38] sm:$0xff]  ;;  %v334_v22 = vld [vmem:[%s2347_s6 + $0x130] sm:$0xff]  ;;  %v1233_v26 = vpack.c.bf16 %v319_v17, %v318_v16  ;;  %v353_v29 = vld [vmem:[%s2347_s6 + $0x1c8] sm:$0xff] }
  0x17   :  { %1061 = vmatmul.mubr.msk.f32.gmra.mrb[4].mxu0 %vm76_vm1, %v30_v52  ;;  %563 = vperm.xlu1 %1424, %v541_v57   ;;  %v335_v23 = vld [vmem:[%s2347_s6 + $0x138] sm:$0xff]  ;;  %v302_v24 = vld [vmem:[%s2347_s6 + $0x30] sm:$0xff]  ;;  %v320_v30 = vld [vmem:[%s2347_s6 + $0xc0] sm:$0xff]  ;;  %v1269_v34 = vpack.c.bf16 %v353_v29, %v352_v28 }
  0x18   :  { %1067 = vmatmul.mubr.msk.f32.gmra.mrb[4].mxu1 %vm76_vm1, %v30_v52  ;;  %184 = vmatprep.mubr.f32.mxu0 %v1425_v3  ;;  %v303_v27 = vld [vmem:[%s2347_s6 + $0x38] sm:$0xff]  ;;  %v321_v31 = vld [vmem:[%s2347_s6 + $0xc8] sm:$0xff]  ;;  %v1267_v32 = vpack.c.bf16 %v335_v23, %v334_v22  ;;  %v336_v35 = vld [vmem:[%s2347_s6 + $0x140] sm:$0xff] }
  0x19   :  { %273 = vmatprep.mubr.f32.mxu1 %v1425_v3  ;;  %1224 = vmatpush3.bf16.msra.mxu0 %v1223_v58  ;;  %v333_v3 = vld [vmem:[%s2347_s6 + $0x128] sm:$0xff]  ;;  %v1235_v33 = vpack.c.bf16 %v303_v27, %v302_v24  ;;  %v304_v37 = vld [vmem:[%s2347_s6 + $0x40] sm:$0xff]  ;;  %v1237_v38 = vpack.c.bf16 %v321_v31, %v320_v30  ;;  %v354_v40 = vld [vmem:[%s2347_s6 + $0x1d0] sm:$0xff] }
  0x1a   :  { %1226 = vmatprep.subr.bf16.mxu0 %v1225_v61  ;;  %568 = vperm.xlu0 %1423, %v542_v5   ;;  %v1263_v20 = vpack.c.bf16 %v333_v3, %v332_v9  ;;  %v337_v36 = vld [vmem:[%s2347_s6 + $0x148] sm:$0xff]  ;;  %v355_v41 = vld [vmem:[%s2347_s6 + $0x1d8] sm:$0xff]  ;;  %v322_v42 = vld [vmem:[%s2347_s6 + $0xd0] sm:$0xff] }
  0x1b   :  { %1062 = vmatmul.mubr.msk.f32.gmra.mrb[6].mxu0 %vm76_vm1, %v31_v56  ;;  %1260 = vmatpush3.bf16.msra.mxu1 %v1259_v6  ;;  %v305_v39 = vld [vmem:[%s2347_s6 + $0x48] sm:$0xff]  ;;  %v323_v43 = vld [vmem:[%s2347_s6 + $0xd8] sm:$0xff]  ;;  %v1271_v44 = vpack.c.bf16 %v337_v36, %v336_v35  ;;  %v1273_v46 = vpack.c.bf16 %v355_v41, %v354_v40  ;;  %v338_v47 = vld [vmem:[%s2347_s6 + $0x150] sm:$0xff] }
  0x1c   :  { %1068 = vmatmul.mubr.msk.f32.gmra.mrb[6].mxu1 %vm76_vm1, %v31_v56  ;;  %573 = vperm.xlu1 %1424, %v543_v7   ;;  %v1239_v45 = vpack.c.bf16 %v305_v39, %v304_v37  ;;  %v339_v48 = vld [vmem:[%s2347_s6 + $0x158] sm:$0xff]  ;;  %v306_v49 = vld [vmem:[%s2347_s6 + $0x50] sm:$0xff]  ;;  %v1241_v50 = vpack.c.bf16 %v323_v43, %v322_v42  ;;  %v356_v52 = vld [vmem:[%s2347_s6 + $0x1e0] sm:$0xff] }
  0x1d   :  { %1228 = vmatpush3.bf16.msra.mxu0 %v1227_v8  ;;  %1262 = vmatprep.subr.bf16.mxu1 %v1261_v10  ;;  %v307_v51 = vld [vmem:[%s2347_s6 + $0x58] sm:$0xff]  ;;  %v357_v53 = vld [vmem:[%s2347_s6 + $0x1e8] sm:$0xff]  ;;  %v324_v54 = vld [vmem:[%s2347_s6 + $0xe0] sm:$0xff]  ;;  %v1275_v56 = vpack.c.bf16 %v339_v48, %v338_v47 }
  0x1e   :  { %1230 = vmatprep.subr.bf16.mxu0 %v1229_v11  ;;  %578 = vperm.xlu0 %1423, %v544_v18   ;;  %v325_v55 = vld [vmem:[%s2347_s6 + $0xe8] sm:$0xff]  ;;  %v1243_v57 = vpack.c.bf16 %v307_v51, %v306_v49  ;;  %v1277_v58 = vpack.c.bf16 %v357_v53, %v356_v52  ;;  %v340_v59 = vld [vmem:[%s2347_s6 + $0x160] sm:$0xff]  ;;  %v358_v2 = vld [vmem:[%s2347_s6 + $0x1f0] sm:$0xff] }
  0x1f   :  { %1264 = vmatpush3.bf16.msra.mxu1 %v1263_v20  ;;  %v341_v60 = vld [vmem:[%s2347_s6 + $0x168] sm:$0xff]  ;;  %v1245_v61 = vpack.c.bf16 %v325_v55, %v324_v54  ;;  %v308_v63 = vld [vmem:[%s2347_s6 + $0x60] sm:$0xff]  ;;  %v359_v4 = vld [vmem:[%s2347_s6 + $0x1f8] sm:$0xff] }
  0x20   :  { %583 = vperm.xlu1 %1424, %v545_v19   ;;  %1266 = vmatprep.subr.bf16.mxu1 %v1265_v25  ;;  %v1279_v62 = vpack.c.bf16 %v341_v60, %v340_v59  ;;  %v309_v0 = vld [vmem:[%s2347_s6 + $0x68] sm:$0xff]  ;;  %v1281_v5 = vpack.c.bf16 %v359_v4, %v358_v2  ;;  %v326_v6 = vld [vmem:[%s2347_s6 + $0xf0] sm:$0xff]  ;;  %v327_v7 = vld [vmem:[%s2347_s6 + $0xf8] sm:$0xff] }
  0x21   :  { %1232 = vmatpush3.bf16.msra.mxu0 %v1231_v21  ;;  %v1247_v1 = vpack.c.bf16 %v309_v0, %v308_v63  ;;  %v342_v8 = vld [vmem:[%s2347_s6 + $0x170] sm:$0xff]  ;;  %v1249_v9 = vpack.c.bf16 %v327_v7, %v326_v6  ;;  %v343_v3 = vld [vmem:[%s2347_s6 + $0x178] sm:$0xff]  ;;  %v726_v14 = vld [vmem:[%s2349_s5 + $0x8] sm:$0xff] }
  0x22   :  { %1234 = vmatprep.subr.bf16.mxu0 %v1233_v26  ;;  %v310_v10 = vld [vmem:[%s2347_s6 + $0x70] sm:$0xff]  ;;  %v311_v11 = vld [vmem:[%s2347_s6 + $0x78] sm:$0xff]  ;;  %v1283_v12 = vpack.c.bf16 %v343_v3, %v342_v8  ;;  %v725_v25 = vld [vmem:[%s2349_s5] sm:$0xff] }
  0x23   :  { %1268 = vmatpush3.bf16.msra.mxu1 %v1267_v32  ;;  %v1251_v13 = vpack.c.bf16 %v311_v11, %v310_v10  ;;  %v728_v15 = vld [vmem:[%s2349_s5 + $0x18] sm:$0xff]  ;;  %v727_v26 = vld [vmem:[%s2349_s5 + $0x10] sm:$0xff]  ;;  %v730_v28 = vld [vmem:[%s2349_s5 + $0x28] sm:$0xff] }
  0x24   :  { %1270 = vmatprep.subr.bf16.mxu1 %v1269_v34  ;;  %v1798_v16 = vpack.c.bf16 %v728_v15, %v726_v14  ;;  %v732_v29 = vld [vmem:[%s2349_s5 + $0x38] sm:$0xff]  ;;  %v734_v48 = vld [vmem:[%s2349_s5 + $0x48] sm:$0xff]  ;;  %v733_v63 = vld [vmem:[%s2349_s5 + $0x40] sm:$0xff] }
  0x25   :  { %1236 = vmatpush3.bf16.msra.mxu0 %v1235_v33  ;;  %v736_v49 = vld [vmem:[%s2349_s5 + $0x58] sm:$0xff]  ;;  %v735_v0 = vld [vmem:[%s2349_s5 + $0x50] sm:$0xff]  ;;  %v738_v2 = vld [vmem:[%s2349_s5 + $0x68] sm:$0xff] }
  0x26   :  { %1238 = vmatprep.subr.bf16.mxu0 %v1237_v38  ;;  %v1826_v38 = vpack.c.bf16 %v727_v26, %v725_v25  ;;  %v740_v4 = vld [vmem:[%s2349_s5 + $0x78] sm:$0xff]  ;;  %v742_v25 = vld [vmem:[%s2349_s5 + $0x88] sm:$0xff] }
  0x27   :  { %1272 = vmatpush3.bf16.msra.mxu1 %v1271_v44  ;;  %v1835_v44 = vpack.c.bf16 %v732_v29, %v730_v28  ;;  %v744_v26 = vld [vmem:[%s2349_s5 + $0x98] sm:$0xff] }
  0x28   :  { %1274 = vmatprep.subr.bf16.mxu1 %v1273_v46  ;;  %v731_v46 = vld [vmem:[%s2349_s5 + $0x30] sm:$0xff] }
  0x29   :  { %1240 = vmatpush3.bf16.msra.mxu0 %v1239_v45  ;;  %v729_v45 = vld [vmem:[%s2349_s5 + $0x20] sm:$0xff] }
  0x2a   :  { %1242 = vmatprep.subr.bf16.mxu0 %v1241_v50 }
  0x2b   :  { %1276 = vmatpush3.bf16.msra.mxu1 %v1275_v56 }
  0x2c   :  { %1278 = vmatprep.subr.bf16.mxu1 %v1277_v58 }
  0x2d   :  { %1244 = vmatpush3.bf16.msra.mxu0 %v1243_v57  ;;  %v1863_v57 = vpack.c.bf16 %v731_v46, %v729_v45  ;;  %v746_v45 = vld [vmem:[%s2349_s5 + $0xa8] sm:$0xff]  ;;  %v748_v46 = vld [vmem:[%s2349_s5 + $0xb8] sm:$0xff] }
  0x2e   :  { %1246 = vmatprep.subr.bf16.mxu0 %v1245_v61 }
  0x2f   :  { %1280 = vmatpush3.bf16.msra.mxu1 %v1279_v62  ;;  %v1873_v62 = vpack.c.bf16 %v736_v49, %v734_v48  ;;  %v1969_v49 = vpack.c.bf16 %v748_v46, %v746_v45  ;;  %v764_v45 = vld [vmem:[%s2349_s5 + $0x138] sm:$0xff] }
  0x30   :  { %1282 = vmatprep.subr.bf16.mxu1 %v1281_v5 }
  0x31   :  { %1248 = vmatpush3.bf16.msra.mxu0 %v1247_v1 }
  0x32   :  { %1250 = vmatprep.subr.bf16.mxu0 %v1249_v9 }
  0x33   :  { %1284 = vmatpush3.bf16.msra.mxu1 %v1283_v12  ;;  %v1901_v12 = vpack.c.bf16 %v735_v0, %v733_v63  ;;  %v749_v63 = vld [vmem:[%s2349_s5 + $0xc0] sm:$0xff]  ;;  %v751_v0 = vld [vmem:[%s2349_s5 + $0xd0] sm:$0xff] }
  0x34   :  { %1294 = vmatprep.subr.bf16.mxu1 %v1798_v16 }
  0x35   :  { %1252 = vmatpush3.bf16.msra.mxu0 %v1251_v13 }
  0x87   :  { %v59_v17 = vpop.permute.xlu0 %58 }
  0x88   :  { %v69_v39 = vpop.permute.xlu1 %68 }
  0x8b   :  { %v64_v30 = vpop.permute.xlu0 %63 }
  0x8c   :  { %v74_v5 = vpop.permute.xlu1 %73 }
  0xe2   :  { %v168_v18 = vpop.f32.mrb[0].mxu0 }
  0xe3   :  { %v1801_v19 = vadd.f32 %v168_v18, %v59_v17  ;;  %v257_v20 = vpop.f32.mrb[0].mxu1  ;;  %v170_v21 = vpop.f32.mrb[1].mxu0  ;;  %v1911_v18 = vpack.c.bf16 %v740_v4, %v738_v2  ;;  %v754_v2 = vld [vmem:[%s2349_s5 + $0xe8] sm:$0xff]  ;;  %v756_v4 = vld [vmem:[%s2349_s5 + $0xf8] sm:$0xff] }
  0xe4   :  { %v1803_v22 = vadd.f32 %v257_v20, %v59_v17  ;;  %v1805_v23 = vadd.f32 %v170_v21, %v59_v17  ;;  %v259_v24 = vpop.f32.mrb[1].mxu1  ;;  %v737_v20 = vld [vmem:[%s2349_s5 + $0x60] sm:$0xff]  ;;  %v739_v21 = vld [vmem:[%s2349_s5 + $0x70] sm:$0xff] }
  0xe5   :  { %v1813_v27 = vadd.f32 %v259_v24, %v59_v17  ;;  %v280_v33 = vmax.f32 %v1801_v19, 0.0  ;;  %v530_v19 = vld [vmem:[%s2350_s3] sm:$0xff] }
  0xe6   :  { %v281_v31 = vmax.f32 %v1805_v23, 0.0  ;;  %v174_v32 = vpop.f32.mrb[2].mxu0  ;;  %v2359_v40 = vmax.f32 %v1803_v22, 0.0  ;;  %v752_v23 = vld [vmem:[%s2349_s5 + $0xd8] sm:$0xff] }
  0xe7   :  { %v283_v34 = vmax.f32 %v1813_v27, 0.0  ;;  %v1824_v35 = vadd.f32 %v174_v32, %v64_v30  ;;  %v263_v36 = vpop.f32.mrb[2].mxu1  ;;  %v176_v37 = vpop.f32.mrb[3].mxu0  ;;  %v1937_v32 = vpack.c.bf16 %v739_v21, %v737_v20  ;;  %v760_v20 = vld [vmem:[%s2349_s5 + $0x118] sm:$0xff] }
  0xe8   :  { %v1829_v41 = vadd.f32 %v263_v36, %v64_v30  ;;  %v1831_v42 = vadd.f32 %v176_v37, %v64_v30  ;;  %v265_v43 = vpop.f32.mrb[3].mxu1  ;;  %424 = vmatprep.mubr.f32.mxu0 %v281_v31  ;;  %v1943_v37 = vpack.c.bf16 %v744_v26, %v742_v25  ;;  %v757_v26 = vld [vmem:[%s2349_s5 + $0x100] sm:$0xff] }
  0xe9   :  { %v1843_v47 = vadd.f32 %v265_v43, %v64_v30  ;;  %509 = vmatprep.mubr.f32.mxu1 %v283_v34  ;;  %425 = vmatmul.mubr.f32.vlgmr.msra.gmra.mrb[8].mxu0 %v280_v33  ;;  %v284_v52 = vmax.f32 %v1824_v35, 0.0  ;;  %v743_v43 = vld [vmem:[%s2349_s5 + $0x90] sm:$0xff] }
  0xea   :  { %v285_v50 = vmax.f32 %v1831_v42, 0.0  ;;  %510 = vmatmul.mubr.f32.vlgmr.msra.gmra.mrb[8].mxu1 %v2359_v40  ;;  %v180_v51 = vpop.f32.mrb[4].mxu0  ;;  %v2357_v58 = vmax.f32 %v1829_v41, 0.0 }
  0xeb   :  { %v2358_v53 = vmax.f32 %v1843_v47, 0.0  ;;  %1296 = vmatpush1.bf16.msra.mxu1 %v1826_v38  ;;  %v1861_v54 = vadd.f32 %v180_v51, %v69_v39  ;;  %v269_v55 = vpop.f32.mrb[4].mxu1  ;;  %v182_v56 = vpop.f32.mrb[5].mxu0  ;;  %v745_v51 = vld [vmem:[%s2349_s5 + $0xa0] sm:$0xff] }
  0xec   :  { %v1866_v59 = vadd.f32 %v269_v55, %v69_v39  ;;  %v1868_v60 = vadd.f32 %v182_v56, %v69_v39  ;;  %v271_v61 = vpop.f32.mrb[5].mxu1  ;;  %429 = vmatprep.mubr.f32.mxu0 %v285_v50  ;;  %1298 = vmatprep.subr.bf16.mxu1 %v1835_v44  ;;  %v747_v55 = vld [vmem:[%s2349_s5 + $0xb0] sm:$0xff]  ;;  %v750_v56 = vld [vmem:[%s2349_s5 + $0xc8] sm:$0xff] }
  0xed   :  { %v1881_v1 = vadd.f32 %v271_v61, %v69_v39  ;;  %514 = vmatprep.mubr.f32.mxu1 %v2358_v53  ;;  %430 = vmatmul.mubr.f32.gmra.mrb[10].mxu0 %v284_v52  ;;  %v288_v8 = vmax.f32 %v1861_v54, 0.0  ;;  %v741_v39 = vld [vmem:[%s2349_s5 + $0x80] sm:$0xff]  ;;  %v1987_v61 = vpack.c.bf16 %v752_v23, %v750_v56  ;;  %v763_v56 = vld [vmem:[%s2349_s5 + $0x130] sm:$0xff]  ;;  %v766_v23 = vld [vmem:[%s2349_s5 + $0x148] sm:$0xff] }
  0xee   :  { %v289_v6 = vmax.f32 %v1868_v60, 0.0  ;;  %515 = vmatmul.mubr.f32.gmra.mrb[10].mxu1 %v2357_v58  ;;  %v186_v7 = vpop.f32.mrb[6].mxu0  ;;  %v2355_v13 = vmax.f32 %v1866_v59, 0.0  ;;  %v1966_v48 = vpack.c.bf16 %v743_v43, %v741_v39  ;;  %v759_v39 = vld [vmem:[%s2349_s5 + $0x110] sm:$0xff]  ;;  %v762_v43 = vld [vmem:[%s2349_s5 + $0x128] sm:$0xff] }
  0xef   :  { %v2356_v9 = vmax.f32 %v1881_v1, 0.0  ;;  %1300 = vmatpush1.bf16.msra.mxu1 %v1863_v57  ;;  %v1899_v3 = vadd.f32 %v186_v7, %v74_v5  ;;  %v275_v10 = vpop.f32.mrb[6].mxu1  ;;  %v188_v11 = vpop.f32.mrb[7].mxu0  ;;  %v2005_v7 = vpack.c.bf16 %v756_v4, %v754_v2  ;;  %v2038_v46 = vpack.c.bf16 %v759_v39, %v757_v26  ;;  %v765_v4 = vld [vmem:[%s2349_s5 + $0x140] sm:$0xff] }
  0xf0   :  { %v1904_v14 = vadd.f32 %v275_v10, %v74_v5  ;;  %v1906_v15 = vadd.f32 %v188_v11, %v74_v5  ;;  %v277_v17 = vpop.f32.mrb[7].mxu1  ;;  %434 = vmatprep.mubr.f32.mxu0 %v289_v6  ;;  %1302 = vmatprep.subr.bf16.mxu1 %v1873_v62  ;;  %v753_v10 = vld [vmem:[%s2349_s5 + $0xe0] sm:$0xff]  ;;  %v755_v11 = vld [vmem:[%s2349_s5 + $0xf0] sm:$0xff] }
  0xf1   :  { %v1919_v24 = vadd.f32 %v277_v17, %v74_v5  ;;  %519 = vmatprep.mubr.f32.mxu1 %v2356_v9  ;;  %435 = vmatmul.mubr.f32.gmra.mrb[12].mxu0 %v288_v8  ;;  %v292_v29 = vmax.f32 %v1899_v3, 0.0  ;;  %v2002_v5 = vpack.c.bf16 %v751_v0, %v749_v63  ;;  %v758_v17 = vld [vmem:[%s2349_s5 + $0x108] sm:$0xff]  ;;  %v2020_v21 = vpack.c.bf16 %v755_v11, %v753_v10  ;;  %v768_v63 = vld [vmem:[%s2349_s5 + $0x158] sm:$0xff]  ;;  %v767_v10 = vld [vmem:[%s2349_s5 + $0x150] sm:$0xff] }
  0xf2   :  { %v293_v28 = vmax.f32 %v1906_v15, 0.0  ;;  %520 = vmatmul.mubr.f32.gmra.mrb[12].mxu1 %v2355_v13  ;;  %v2353_v36 = vmax.f32 %v1904_v14, 0.0  ;;  %v2023_v25 = vpack.c.bf16 %v760_v20, %v758_v17  ;;  %v2059_v2 = vpack.c.bf16 %v768_v63, %v766_v23  ;;  %v770_v11 = vld [vmem:[%s2349_s5 + $0x168] sm:$0xff]  ;;  %v772_v17 = vld [vmem:[%s2349_s5 + $0x178] sm:$0xff]  ;;  %v769_v39 = vld [vmem:[%s2349_s5 + $0x160] sm:$0xff] }
  0xf3   :  { %v2354_v30 = vmax.f32 %v1919_v24, 0.0  ;;  %1304 = vmatpush1.bf16.msra.mxu1 %v1901_v12  ;;  %v2074_v20 = vpack.c.bf16 %v767_v10, %v765_v4  ;;  %v2077_v26 = vpack.c.bf16 %v772_v17, %v770_v11  ;;  %v773_v63 = vld [vmem:[%s2349_s5 + $0x180] sm:$0xff]  ;;  %v775_v4 = vld [vmem:[%s2349_s5 + $0x190] sm:$0xff]  ;;  %v778_v10 = vld [vmem:[%s2349_s5 + $0x1a8] sm:$0xff] }
  0xf4   :  { %439 = vmatprep.mubr.f32.mxu0 %v293_v28  ;;  %1306 = vmatprep.subr.bf16.mxu1 %v1911_v18  ;;  %v780_v11 = vld [vmem:[%s2349_s5 + $0x1b8] sm:$0xff]  ;;  %v2110_v17 = vpack.c.bf16 %v775_v4, %v773_v63  ;;  %v787_v13 = vld [vmem:[%s2349_s5 + $0x1f0] sm:$0xff] }
  0xf5   :  { %524 = vmatprep.mubr.f32.mxu1 %v2354_v30  ;;  %440 = vmatmul.mubr.f32.gmra.mrb[14].mxu0 %v292_v29  ;;  %v784_v63 = vld [vmem:[%s2349_s5 + $0x1d8] sm:$0xff]  ;;  %v786_v30 = vld [vmem:[%s2349_s5 + $0x1e8] sm:$0xff] }
  0xf6   :  { %525 = vmatmul.mubr.f32.gmra.mrb[14].mxu1 %v2353_v36  ;;  %v783_v36 = vld [vmem:[%s2349_s5 + $0x1d0] sm:$0xff]  ;;  %1193 = vmatprep.mubr.msk.f32.mxu0 %vm586_vm2, %v530_v19 }
  0xf7   :  { %1308 = vmatpush1.bf16.msra.mxu1 %v1937_v32  ;;  %853 = vmatprep.mubr.f32.mxu1 %v281_v31  ;;  %v1984_v31 = vpack.c.bf16 %v747_v55, %v745_v51  ;;  %v2041_v51 = vpack.c.bf16 %v764_v45, %v762_v43  ;;  %v761_v55 = vld [vmem:[%s2349_s5 + $0x120] sm:$0xff]  ;;  %v771_v43 = vld [vmem:[%s2349_s5 + $0x170] sm:$0xff]  ;;  %v774_v45 = vld [vmem:[%s2349_s5 + $0x188] sm:$0xff] }
  0xf8   :  { %1310 = vmatprep.subr.bf16.mxu1 %v1943_v37  ;;  %v2056_v0 = vpack.c.bf16 %v763_v56, %v761_v55  ;;  %v776_v55 = vld [vmem:[%s2349_s5 + $0x198] sm:$0xff]  ;;  %v2092_v56 = vpack.c.bf16 %v771_v43, %v769_v39  ;;  %v2113_v39 = vpack.c.bf16 %v780_v11, %v778_v10  ;;  %v777_v43 = vld [vmem:[%s2349_s5 + $0x1a0] sm:$0xff] }
  0xf9   :  { %v2095_v23 = vpack.c.bf16 %v776_v55, %v774_v45  ;;  %v779_v45 = vld [vmem:[%s2349_s5 + $0x1b0] sm:$0xff]  ;;  %v782_v55 = vld [vmem:[%s2349_s5 + $0x1c8] sm:$0xff]  ;;  %v781_v11 = vld [vmem:[%s2349_s5 + $0x1c0] sm:$0xff] }
  0xfa   :  { %v2128_v4 = vpack.c.bf16 %v779_v45, %v777_v43  ;;  %v2131_v10 = vpack.c.bf16 %v784_v63, %v782_v55  ;;  %v788_v43 = vld [vmem:[%s2349_s5 + $0x1f8] sm:$0xff]  ;;  %v2146_v45 = vpack.c.bf16 %v783_v36, %v781_v11  ;;  %v785_v63 = vld [vmem:[%s2349_s5 + $0x1e0] sm:$0xff] }
  0xfb   :  { %1312 = vmatpush1.bf16.msra.mxu1 %v1966_v48  ;;  %v2149_v55 = vpack.c.bf16 %v788_v43, %v786_v30  ;;  %v2158_v9 = vpack.c.bf16 %v787_v13, %v785_v63 }
  0xfc   :  { %1314 = vmatprep.subr.bf16.mxu1 %v1969_v49 }
  0xff   :  { %1316 = vmatpush1.bf16.msra.mxu1 %v1984_v31 }
 0x100   :  { %1318 = vmatprep.subr.bf16.mxu1 %v1987_v61 }
 0x103   :  { %1320 = vmatpush1.bf16.msra.mxu1 %v2002_v5 }
 0x104   :  { %1322 = vmatprep.subr.bf16.mxu1 %v2005_v7 }
 0x107   :  { %1324 = vmatpush1.bf16.msra.mxu1 %v2020_v21 }
 0x108   :  { %1326 = vmatprep.subr.bf16.mxu1 %v2023_v25 }
 0x10b   :  { %1328 = vmatpush1.bf16.msra.mxu1 %v2038_v46 }
 0x10c   :  { %1330 = vmatprep.subr.bf16.mxu1 %v2041_v51 }
 0x10f   :  { %1332 = vmatpush1.bf16.msra.mxu1 %v2056_v0 }
 0x110   :  { %1334 = vmatprep.subr.bf16.mxu1 %v2059_v2 }
 0x113   :  { %1336 = vmatpush1.bf16.msra.mxu1 %v2074_v20 }
 0x114   :  { %1338 = vmatprep.subr.bf16.mxu1 %v2077_v26 }
 0x117   :  { %1340 = vmatpush1.bf16.msra.mxu1 %v2092_v56 }
 0x118   :  { %1342 = vmatprep.subr.bf16.mxu1 %v2095_v23 }
 0x11b   :  { %1344 = vmatpush1.bf16.msra.mxu1 %v2110_v17 }
 0x11c   :  { %1346 = vmatprep.subr.bf16.mxu1 %v2113_v39 }
 0x11f   :  { %1348 = vmatpush1.bf16.msra.mxu1 %v2128_v4 }
 0x120   :  { %1350 = vmatprep.subr.bf16.mxu1 %v2131_v10 }
 0x123   :  { %1352 = vmatpush1.bf16.msra.mxu1 %v2146_v45 }
 0x124   :  { %1354 = vmatprep.subr.bf16.mxu1 %v2149_v55 }
 0x127   :  { %1356 = vmatpush1.bf16.msra.mxu1 %v2158_v9 }
 0x12a   :  { %854 = vmatmul.mubr.f32.vlgmr.msra.gmra.mrb[16].mxu1 %v280_v33 }
 0x12b   :  { %859 = vmatprep.mubr.f32.mxu1 %v285_v50 }
 0x12e   :  { %860 = vmatmul.mubr.f32.gmra.mrb[18].mxu1 %v284_v52 }
 0x12f   :  { %865 = vmatprep.mubr.f32.mxu1 %v289_v6 }
 0x132   :  { %866 = vmatmul.mubr.f32.gmra.mrb[20].mxu1 %v288_v8 }
 0x133   :  { %871 = vmatprep.mubr.f32.mxu1 %v293_v28 }
 0x136   :  { %872 = vmatmul.mubr.f32.gmra.mrb[22].mxu1 %v292_v29 }
 0x1bc   :  { %v1117_v33 = vpop.f32.mrb[8].mxu0 }
 0x1bd   :  { %v1161_v35 = vpop.f32.mrb[8].mxu1  ;;  %v1118_v42 = vpop.f32.mrb[9].mxu0 }
 0x1be   :  { %v1119_v50 = vadd.f32 %v1118_v42, %v1117_v33  ;;  %v1162_v52 = vpop.f32.mrb[9].mxu1 }
 0x1bf   :  { %v1163_v54 = vadd.f32 %v1162_v52, %v1161_v35 }
 0x1c0   :  { %v1120_v60 = vpop.f32.mrb[10].mxu0 }
 0x1c1   :  { %v512_v6 = vadd.f32 %v1163_v54, %v1119_v50  ;;  %v1164_v8 = vpop.f32.mrb[10].mxu1  ;;  %v1121_v13 = vpop.f32.mrb[11].mxu0 }
 0x1c2   :  { %v1122_v15 = vadd.f32 %v1121_v13, %v1120_v60  ;;  %v1165_v3 = vpop.f32.mrb[11].mxu1 }
 0x1c3   :  { %v1166_v28 = vadd.f32 %v1165_v3, %v1164_v8  ;;  %v531_v8 = vld [vmem:[%s2350_s3 + $0x8] sm:$0xff] }
 0x1c4   :  { %v1123_v29 = vpop.f32.mrb[12].mxu0 }
 0x1c5   :  { %v517_v30 = vadd.f32 %v1166_v28, %v1122_v15  ;;  %v1167_v36 = vpop.f32.mrb[12].mxu1  ;;  %v1124_v11 = vpop.f32.mrb[13].mxu0 }
 0x1c6   :  { %v1125_v43 = vadd.f32 %v1124_v11, %v1123_v29  ;;  %v1168_v63 = vpop.f32.mrb[13].mxu1 }
 0x1c7   :  { %v1169_v19 = vadd.f32 %v1168_v63, %v1167_v36  ;;  %v1285_v58 = vpack.c.bf16 %v517_v30, %v512_v6  ;;  %v532_v6 = vld [vmem:[%s2350_s3 + $0x10] sm:$0xff] }
 0x1c8   :  { %v1126_v53 = vpop.f32.mrb[14].mxu0 }
 0x1c9   :  { %v522_v40 = vadd.f32 %v1169_v19, %v1125_v43  ;;  %v1170_v33 = vpop.f32.mrb[14].mxu1  ;;  %1286 = vmatprep.subr.bf16.mxu0 %v1285_v58  ;;  %v1127_v35 = vpop.f32.mrb[15].mxu0 }
 0x1ca   :  { %v1128_v42 = vadd.f32 %v1127_v35, %v1126_v53  ;;  %v1171_v50 = vpop.f32.mrb[15].mxu1  ;;  %1288 = vmatpush3.bf16.msra.mxu0 %v1285_v58  ;;  %v537_v53 = vld [vmem:[%s2350_s3 + $0x38] sm:$0xff] }
 0x1cb   :  { %v1172_v52 = vadd.f32 %v1171_v50, %v1170_v33 }
 0x1cd   :  { %v527_v54 = vadd.f32 %v1172_v52, %v1128_v42 }
 0x1cf   :  { %v1289_v60 = vpack.c.bf16 %v527_v54, %v522_v40  ;;  %v533_v40 = vld [vmem:[%s2350_s3 + $0x18] sm:$0xff] }
 0x1d1   :  { %1290 = vmatprep.subr.bf16.mxu0 %v1289_v60 }
 0x1d2   :  { %1292 = vmatpush3.bf16.msra.mxu0 %v1289_v60 }
 0x1d3   :  { %1358 = vmatprep.subr.bf16.mxu0 %v1798_v16  ;;  %v534_v16 = vld [vmem:[%s2350_s3 + $0x20] sm:$0xff] }
 0x1d5   :  { %1194 = vmatmul.mubr.msk.f32.vlgmr.msra.gmra.mrb[16].mxu0 %vm586_vm2, %v531_v8 }
 0x1d6   :  { %1360 = vmatpush1.bf16.msra.mxu0 %v1826_v38  ;;  %1196 = vmatprep.mubr.msk.f32.mxu0 %vm586_vm2, %v532_v6  ;;  %v535_v38 = vld [vmem:[%s2350_s3 + $0x28] sm:$0xff] }
 0x1d7   :  { %1362 = vmatprep.subr.bf16.mxu0 %v1835_v44  ;;  %v536_v44 = vld [vmem:[%s2350_s3 + $0x30] sm:$0xff] }
 0x1d9   :  { %1197 = vmatmul.mubr.msk.f32.gmra.mrb[18].mxu0 %vm586_vm2, %v533_v40 }
 0x1da   :  { %1364 = vmatpush1.bf16.msra.mxu0 %v1863_v57  ;;  %1199 = vmatprep.mubr.msk.f32.mxu0 %vm586_vm2, %v534_v16 }
 0x1db   :  { %1366 = vmatprep.subr.bf16.mxu0 %v1873_v62 }
 0x1dd   :  { %1200 = vmatmul.mubr.msk.f32.gmra.mrb[20].mxu0 %vm586_vm2, %v535_v38 }
 0x1de   :  { %1368 = vmatpush1.bf16.msra.mxu0 %v1901_v12  ;;  %1202 = vmatprep.mubr.msk.f32.mxu0 %vm586_vm2, %v536_v44 }
 0x1df   :  { %1370 = vmatprep.subr.bf16.mxu0 %v1911_v18 }
 0x1e1   :  { %1203 = vmatmul.mubr.msk.f32.gmra.mrb[22].mxu0 %vm586_vm2, %v537_v53 }
 0x1e2   :  { %1372 = vmatpush1.bf16.msra.mxu0 %v1937_v32  ;;  %1015 = vmatprep.mubr.f32.mxu0 %v283_v34 }
 0x1e3   :  { %1374 = vmatprep.subr.bf16.mxu0 %v1943_v37  ;;  %v2360_v37 = vmax.f32 %v1803_v22, 0.0  ;;  %v554_v22 = vpop.permute.xlu1 %553 }
 0x1e6   :  { %1376 = vmatpush1.bf16.msra.mxu0 %v1966_v48  ;;  %v2361_v48 = vmax.f32 %v1843_v47, 0.0 }
 0x1e7   :  { %1378 = vmatprep.subr.bf16.mxu0 %v1969_v49  ;;  %v2362_v49 = vmax.f32 %v1829_v41, 0.0 }
 0x1ea   :  { %1380 = vmatpush1.bf16.msra.mxu0 %v1984_v31  ;;  %v2363_v31 = vmax.f32 %v1881_v1, 0.0 }
 0x1eb   :  { %1382 = vmatprep.subr.bf16.mxu0 %v1987_v61  ;;  %v2364_v61 = vmax.f32 %v1866_v59, 0.0 }
 0x1ee   :  { %1384 = vmatpush1.bf16.msra.mxu0 %v2002_v5  ;;  %v2365_v5 = vmax.f32 %v1919_v24, 0.0 }
 0x1ef   :  { %1386 = vmatprep.subr.bf16.mxu0 %v2005_v7  ;;  %v549_v7 = vpop.permute.xlu0 %548 }
 0x1f2   :  { %1388 = vmatpush1.bf16.msra.mxu0 %v2020_v21  ;;  %v564_v21 = vpop.permute.xlu1 %563 }
 0x1f3   :  { %1390 = vmatprep.subr.bf16.mxu0 %v2023_v25  ;;  %v559_v25 = vpop.permute.xlu0 %558 }
 0x1f6   :  { %1392 = vmatpush1.bf16.msra.mxu0 %v2038_v46  ;;  %v574_v24 = vpop.permute.xlu1 %573 }
 0x1f7   :  { %1394 = vmatprep.subr.bf16.mxu0 %v2041_v51 }
 0x1fa   :  { %1396 = vmatpush1.bf16.msra.mxu0 %v2056_v0 }
 0x1fb   :  { %1398 = vmatprep.subr.bf16.mxu0 %v2059_v2  ;;  %v569_v2 = vpop.permute.xlu0 %568 }
 0x1fd   :  { %v855_v27 = vpop.f32.mrb[16].mxu1 }
 0x1fe   :  { %878 = vst [vmem:[%s2351_s7] sm:$0xff] %v855_v27  ;;  %v857_v34 = vpop.f32.mrb[17].mxu1  ;;  %1400 = vmatpush1.bf16.msra.mxu0 %v2074_v20 }
 0x1ff   :  { %880 = vst.msk [vmem:[%s2351_s7 + $0x8] sm:$0xff] %vm879_vm3, %v857_v34  ;;  %1402 = vmatprep.subr.bf16.mxu0 %v2077_v26 }
 0x201   :  { %v861_v57 = vpop.f32.mrb[18].mxu1 }
 0x202   :  { %881 = vst [vmem:[%s2351_s7 + $0x10] sm:$0xff] %v861_v57  ;;  %v863_v58 = vpop.f32.mrb[19].mxu1  ;;  %1404 = vmatpush1.bf16.msra.mxu0 %v2092_v56 }
 0x203   :  { %882 = vst.msk [vmem:[%s2351_s7 + $0x18] sm:$0xff] %vm879_vm3, %v863_v58  ;;  %1406 = vmatprep.subr.bf16.mxu0 %v2095_v23 }
 0x205   :  { %v867_v62 = vpop.f32.mrb[20].mxu1 }
 0x206   :  { %883 = vst [vmem:[%s2351_s7 + $0x20] sm:$0xff] %v867_v62  ;;  %v869_v12 = vpop.f32.mrb[21].mxu1  ;;  %1408 = vmatpush1.bf16.msra.mxu0 %v2110_v17  ;;  %v584_v17 = vpop.permute.xlu1 %583 }
 0x207   :  { %884 = vst.msk [vmem:[%s2351_s7 + $0x28] sm:$0xff] %vm879_vm3, %v869_v12  ;;  %1410 = vmatprep.subr.bf16.mxu0 %v2113_v39 }
 0x209   :  { %v873_v18 = vpop.f32.mrb[22].mxu1 }
 0x20a   :  { %885 = vst [vmem:[%s2351_s7 + $0x30] sm:$0xff] %v873_v18  ;;  %v875_v32 = vpop.f32.mrb[23].mxu1  ;;  %1412 = vmatpush1.bf16.msra.mxu0 %v2128_v4  ;;  %v579_v4 = vpop.permute.xlu0 %578 }
 0x20b   :  { %886 = vst.msk [vmem:[%s2351_s7 + $0x38] sm:$0xff] %vm879_vm3, %v875_v32  ;;  %1414 = vmatprep.subr.bf16.mxu0 %v2131_v10 }
 0x20e   :  { %1416 = vmatpush1.bf16.msra.mxu0 %v2146_v45 }
 0x20f   :  { %1418 = vmatprep.subr.bf16.mxu0 %v2149_v55 }
 0x212   :  { %1420 = vmatpush1.bf16.msra.mxu0 %v2158_v9  ;;  %v2366_v9 = vmax.f32 %v1904_v14, 0.0 }
 0x215   :  { %1016 = vmatmul.mubr.f32.vlgmr.msra.gmra.mrb[24].mxu0 %v2360_v37 }
 0x216   :  { %1021 = vmatprep.mubr.f32.mxu0 %v2361_v48 }
 0x219   :  { %1022 = vmatmul.mubr.f32.gmra.mrb[26].mxu0 %v2362_v49 }
 0x21a   :  { %1027 = vmatprep.mubr.f32.mxu0 %v2363_v31 }
 0x21d   :  { %1028 = vmatmul.mubr.f32.gmra.mrb[28].mxu0 %v2364_v61 }
 0x21e   :  { %1033 = vmatprep.mubr.f32.mxu0 %v2365_v5 }
 0x221   :  { %1034 = vmatmul.mubr.f32.gmra.mrb[30].mxu0 %v2366_v9 }
 0x2a8   :  { %v1195_v47 = vpop.f32.mrb[16].mxu0 }
 0x2a9   :  { %v683_v41 = vadd.f32 %v1195_v47, %v554_v22  ;;  %v677_v46 = vpop.f32.mrb[17].mxu0 }
 0x2aa   :  { %v678_v51 = vadd.f32 %v677_v46, %v549_v7 }
 0x2ab   :  { %718 = vst.msk [vmem:[%s2352_s8 + $0x8] sm:$0xff] %vm716_vm4, %v683_v41 }
 0x2ac   :  { %717 = vst.msk [vmem:[%s2352_s8] sm:$0xff] %vm716_vm4, %v678_v51  ;;  %v1198_v59 = vpop.f32.mrb[18].mxu0 }
 0x2ad   :  { %v693_v1 = vadd.f32 %v1198_v59, %v564_v21  ;;  %v687_v14 = vpop.f32.mrb[19].mxu0 }
 0x2ae   :  { %v688_v0 = vadd.f32 %v687_v14, %v559_v25 }
 0x2af   :  { %720 = vst.msk [vmem:[%s2352_s8 + $0x18] sm:$0xff] %vm716_vm4, %v693_v1 }
 0x2b0   :  { %719 = vst.msk [vmem:[%s2352_s8 + $0x10] sm:$0xff] %vm716_vm4, %v688_v0  ;;  %v1201_v20 = vpop.f32.mrb[20].mxu0 }
 0x2b1   :  { %v703_v26 = vadd.f32 %v1201_v20, %v574_v24  ;;  %v697_v56 = vpop.f32.mrb[21].mxu0 }
 0x2b2   :  { %v698_v23 = vadd.f32 %v697_v56, %v569_v2 }
 0x2b3   :  { %722 = vst.msk [vmem:[%s2352_s8 + $0x28] sm:$0xff] %vm716_vm4, %v703_v26 }
 0x2b4   :  { %721 = vst.msk [vmem:[%s2352_s8 + $0x20] sm:$0xff] %vm716_vm4, %v698_v23  ;;  %v1204_v39 = vpop.f32.mrb[22].mxu0 }
 0x2b5   :  { %v713_v10 = vadd.f32 %v1204_v39, %v584_v17  ;;  %v707_v45 = vpop.f32.mrb[23].mxu0 }
 0x2b6   :  { %v708_v55 = vadd.f32 %v707_v45, %v579_v4 }
 0x2b7   :  { %724 = vst.msk [vmem:[%s2352_s8 + $0x38] sm:$0xff] %vm716_vm4, %v713_v10 }
 0x2b8   :  { %723 = vst.msk [vmem:[%s2352_s8 + $0x30] sm:$0xff] %vm716_vm4, %v708_v55 }
 0x2e8   :  { %v1017_v13 = vpop.f32.mrb[24].mxu0 }
 0x2e9   :  { %1077 = vst [vmem:[%s2351_s7 + $0x40] sm:$0xff] %v1017_v13  ;;  %v1019_v15 = vpop.f32.mrb[25].mxu0 }
 0x2ea   :  { %1078 = vst.msk [vmem:[%s2351_s7 + $0x48] sm:$0xff] %vm879_vm3, %v1019_v15 }
 0x2ec   :  { %v1023_v3 = vpop.f32.mrb[26].mxu0 }
 0x2ed   :  { %1079 = vst [vmem:[%s2351_s7 + $0x50] sm:$0xff] %v1023_v3  ;;  %v1025_v28 = vpop.f32.mrb[27].mxu0 }
 0x2ee   :  { %1080 = vst.msk [vmem:[%s2351_s7 + $0x58] sm:$0xff] %vm879_vm3, %v1025_v28 }
 0x2f0   :  { %v1029_v29 = vpop.f32.mrb[28].mxu0 }
 0x2f1   :  { %1081 = vst [vmem:[%s2351_s7 + $0x60] sm:$0xff] %v1029_v29  ;;  %v1031_v30 = vpop.f32.mrb[29].mxu0 }
 0x2f2   :  { %1082 = vst.msk [vmem:[%s2351_s7 + $0x68] sm:$0xff] %vm879_vm3, %v1031_v30 }
 0x2f4   :  { %v1035_v36 = vpop.f32.mrb[30].mxu0 }
 0x2f5   :  { %1083 = vst [vmem:[%s2351_s7 + $0x70] sm:$0xff] %v1035_v36  ;;  %v1037_v11 = vpop.f32.mrb[31].mxu0 }
 0x2f6   :  { %1084 = vst.msk [vmem:[%s2351_s7 + $0x78] sm:$0xff] %vm879_vm3, %v1037_v11 }

</bundles_post_ra>
